<compile_context>
chip_gen: v5e
topology: v5e:2x2
jax: 0.10.0
libtpu: 0.0.40
codegen_flags: <defaults>
</compile_context>

<pallas_src>
import math

import numpy as np
import jax
import jax.numpy as jnp
from jax import lax
from jax.experimental import pallas as pl
from jax.experimental.pallas import tpu as pltpu

BN_EPS = 1e-5
LANE = 128  # padded feature width / lane-tile size


def _make_kernel(z_dim, input_dim, row_offsets, row_sizes):
    """Builds the fused 4-layer kernel with static packing metadata baked in."""

    def kernel(noise_ref, inp_ref, w_ref, gb_ref, o_ref, x_ref):
        B = noise_ref.shape[0]
        inv_b = 1.0 / B  # static (trace-time) batch size

        # --- In-kernel concat (layer-1 input), lane-tile aligned ------------------------
        # noise -> lanes [0, z_dim), input -> lanes [LANE, LANE + input_dim); everything
        # else zero.  Matching W1 rows are packed at the same offsets, so one dot suffices.
        x_ref[...] = jnp.zeros_like(x_ref)
        x_ref[:, 0:z_dim] = noise_ref[...]
        x_ref[:, LANE:LANE + input_dim] = inp_ref[...]

        gb = gb_ref[...]                       # (8, 128) f32: rows 0-3 gamma, rows 4-7 beta
        h = x_ref[...].astype(jnp.bfloat16)    # bf16 MXU operand; elementwise math stays f32

        out = None
        for l in range(4):
            r0, rs = row_offsets[l], row_sizes[l]
            w = w_ref[r0:r0 + rs, :]           # tile-aligned bf16 slice (view, no copy)
            y = jnp.dot(h, w, preferred_element_type=jnp.float32)   # (B, 128) f32

            # Train-mode BatchNorm1d (biased batch stats, two-pass var) + sigmoid, fused.
            mean = jnp.sum(y, axis=0, keepdims=True) * inv_b
            d = y - mean
            var = jnp.sum(d * d, axis=0, keepdims=True) * inv_b
            scale = gb[l:l + 1, :] * lax.rsqrt(var + BN_EPS)        # gamma * rsqrt(var+eps)
            z = d * scale + gb[4 + l:5 + l, :]                      # one FMA + beta
            out = 0.5 * jnp.tanh(0.5 * z) + 0.5                     # sigmoid via tanh (EUP)
            h = out.astype(jnp.bfloat16)

        o_ref[...] = out[:, :o_ref.shape[1]].astype(o_ref.dtype)

    return kernel


def xavier_normal(key, fan_in, fan_out):
    # matches torch.nn.init.xavier_normal_ (gain=1): std = sqrt(2/(fan_in+fan_out)).
    # PyTorch Linear weight is (out, in); we store its transpose (in, out).
    std = math.sqrt(2.0 / (fan_in + fan_out))
    return jax.random.normal(key, (fan_in, fan_out), dtype=jnp.float32) * std


def make_params(key, z_dim, input_dim, hidden_dim, output_dim):
    """Raw f32 parameters [w, gamma, beta] x 4 (Linear bias omitted: cancels under train BN)."""
    dims = [z_dim + input_dim, hidden_dim * 4, hidden_dim * 2, hidden_dim, output_dim]
    params = []
    keys = jax.random.split(key, 4)
    for i in range(4):
        d_in, d_out = dims[i], dims[i + 1]
        params.append(xavier_normal(keys[i], d_in, d_out))            # Linear weight
        params.append(jnp.ones((1, d_out), dtype=jnp.float32))        # BN gamma (default)
        params.append(jnp.zeros((1, d_out), dtype=jnp.float32))       # BN beta  (default)
    return params, dims


def pack_params(params, z_dim, input_dim, hidden_dim, output_dim):
    """One-time host-side packing into (a) a bf16 weight slab, (b) an f32 gamma/beta slab."""
    d_out = [hidden_dim * 4, hidden_dim * 2, hidden_dim, output_dim]
    assert z_dim <= LANE and input_dim <= LANE and all(d <= LANE for d in d_out), (
        "demo packing assumes all feature widths <= 128")  # TODO(synk): tile wider layers

    # Layer-1 contraction is the padded concat scratch: [noise | pad | input | pad] = 2*LANE.
    row_sizes = (2 * LANE, LANE, LANE, LANE)
    row_offsets = tuple(int(x) for x in np.cumsum((0,) + row_sizes[:-1]))

    wbuf = np.zeros((sum(row_sizes), LANE), np.float32)
    w1 = np.asarray(params[0])                                   # (z+in, hd*4)
    wbuf[0:z_dim, :d_out[0]] = w1[:z_dim]                        # noise block at lane 0
    wbuf[LANE:LANE + input_dim, :d_out[0]] = w1[z_dim:]          # input block at lane 128
    for l in range(1, 4):
        w = np.asarray(params[3 * l])                            # (d_in, d_out), zero-padded
        r0 = row_offsets[l]
        wbuf[r0:r0 + w.shape[0], :w.shape[1]] = w                # zero rows kill padded-col 0.5s

    gbbuf = np.zeros((8, LANE), np.float32)
    gbbuf[0:4, :] = 1.0                                          # padded gamma (value irrelevant)
    for l in range(4):
        gbbuf[l, :d_out[l]] = np.asarray(params[3 * l + 1]).reshape(-1)
        gbbuf[4 + l, :d_out[l]] = np.asarray(params[3 * l + 2]).reshape(-1)

    return (jnp.asarray(wbuf, jnp.bfloat16), jnp.asarray(gbbuf, jnp.float32),
            row_offsets, row_sizes)


def beat_generator_forward(noise, input_tensor, wbuf, gbbuf, row_offsets, row_sizes,
                           z_dim, input_dim, output_dim):
    noise = jnp.asarray(noise, jnp.float32)
    input_tensor = jnp.asarray(input_tensor, jnp.float32)
    B = noise.shape[0]

    kernel = _make_kernel(z_dim, input_dim, row_offsets, row_sizes)
    vmem = pl.BlockSpec(memory_space=pltpu.MemorySpace.VMEM)

    # Ungridded, whole-array VMEM blocks: 4 input DMAs total; ~170 KiB of parameters.
    return pl.pallas_call(
        kernel,
        out_shape=jax.ShapeDtypeStruct((B, output_dim), jnp.float32),
        in_specs=[vmem, vmem, vmem, vmem],
        out_specs=vmem,
        scratch_shapes=[pltpu.VMEM((B, 2 * LANE), jnp.float32)],
    )(noise, input_tensor, wbuf, gbbuf)


def reference_forward(noise, input_tensor, params, emulate_bf16=False):
    """Pure-JAX reference of the module math (bias = 0 per weights_init, train-mode BN)."""
    h = jnp.concatenate([noise, input_tensor], axis=1).astype(jnp.float32)
    for i in range(4):
        w, g, be = params[3 * i: 3 * i + 3]
        if emulate_bf16:   # mirror the kernel's bf16 MXU operands (f32 accumulation)
            hm = h.astype(jnp.bfloat16).astype(jnp.float32)
            wm = w.astype(jnp.bfloat16).astype(jnp.float32)
        else:
            hm, wm = h, w
        y = hm @ wm
        mean = jnp.mean(y, axis=0, keepdims=True)
        var = jnp.mean((y - mean) ** 2, axis=0, keepdims=True)
        h = jax.nn.sigmoid(g * (y - mean) / jnp.sqrt(var + BN_EPS) + be)
    return h


if __name__ == "__main__":
    # Small shapes consistent with the module's forward.
    B = 8
    z_dim = 10
    input_dim = 10          # module default: input_dim = z_dim when None
    hidden_dim = 32
    output_dim = 16

    key = jax.random.PRNGKey(0)
    k_params, k_noise, k_inp = jax.random.split(key, 3)

    params, _ = make_params(k_params, z_dim, input_dim, hidden_dim, output_dim)
    wbuf, gbbuf, row_offsets, row_sizes = pack_params(params, z_dim, input_dim,
                                                      hidden_dim, output_dim)

    noise = jax.random.normal(k_noise, (B, z_dim), dtype=jnp.float32)
    input_tensor = jax.random.normal(k_inp, (B, input_dim), dtype=jnp.float32)

    out = beat_generator_forward(noise, input_tensor, wbuf, gbbuf, row_offsets, row_sizes,
                                 z_dim, input_dim, output_dim)
    out = jax.block_until_ready(out)

    ref_bf16 = reference_forward(noise, input_tensor, params, emulate_bf16=True)
    ref_f32 = reference_forward(noise, input_tensor, params, emulate_bf16=False)

    assert out.shape == (B, output_dim)
    # Tight functional check against the same bf16-operand math the kernel performs.
    assert jnp.max(jnp.abs(out - ref_bf16)) < 5e-3
    # Looser check against the original full-f32 module math (bf16 MXU operands per review).
    assert jnp.max(jnp.abs(out - ref_f32)) < 3e-2

    print("KERNEL_OK")
</pallas_src>

<mosaic_0001>
module attributes {stable_mosaic.version = 11 : i64} {
  func.func @kernel(%arg0: memref<8x10xf32, #tpu.memory_space<vmem>>, %arg1: memref<8x10xf32, #tpu.memory_space<vmem>>, %arg2: memref<640x128xbf16, #tpu.memory_space<vmem>>, %arg3: memref<8x128xf32, #tpu.memory_space<vmem>>, %arg4: memref<8x16xf32, #tpu.memory_space<vmem>>, %arg5: memref<8x256xf32, #tpu.memory_space<vmem>>) attributes {dimension_semantics = [], scalar_prefetch = 0 : i64, scratch_operands = 1 : i64, tpu.core_type = #tpu.core_type<tc>} {
    %cst = arith.constant 0.000000e+00 : f32
    %0 = vector.broadcast %cst : f32 to vector<8x256xf32>
    %c0 = arith.constant 0 : index
    %c0_0 = arith.constant 0 : index
    %1 = vector.load %arg5[%c0, %c0_0] : memref<8x256xf32, #tpu.memory_space<vmem>>, vector<8x256xf32>
    tpu.vector_store %arg5[%c0, %c0_0], %0 {strides = array<i32>} : memref<8x256xf32, #tpu.memory_space<vmem>>, vector<8x256xf32>,
    %c0_1 = arith.constant 0 : index
    %c0_2 = arith.constant 0 : index
    %2 = vector.load %arg0[%c0_1, %c0_2] : memref<8x10xf32, #tpu.memory_space<vmem>>, vector<8x10xf32>
    %c0_3 = arith.constant 0 : index
    %c0_4 = arith.constant 0 : index
    %3 = vector.load %arg5[%c0_3, %c0_4] : memref<8x256xf32, #tpu.memory_space<vmem>>, vector<8x10xf32>
    tpu.vector_store %arg5[%c0_3, %c0_4], %2 {strides = array<i32>} : memref<8x256xf32, #tpu.memory_space<vmem>>, vector<8x10xf32>,
    %c0_5 = arith.constant 0 : index
    %c0_6 = arith.constant 0 : index
    %4 = vector.load %arg1[%c0_5, %c0_6] : memref<8x10xf32, #tpu.memory_space<vmem>>, vector<8x10xf32>
    %c0_7 = arith.constant 0 : index
    %c128 = arith.constant 128 : index
    %5 = vector.load %arg5[%c0_7, %c128] : memref<8x256xf32, #tpu.memory_space<vmem>>, vector<8x10xf32>
    tpu.vector_store %arg5[%c0_7, %c128], %4 {strides = array<i32>} : memref<8x256xf32, #tpu.memory_space<vmem>>, vector<8x10xf32>,
    %c0_8 = arith.constant 0 : index
    %c0_9 = arith.constant 0 : index
    %6 = vector.load %arg3[%c0_8, %c0_9] : memref<8x128xf32, #tpu.memory_space<vmem>>, vector<8x128xf32>
    %c0_10 = arith.constant 0 : index
    %c0_11 = arith.constant 0 : index
    %7 = vector.load %arg5[%c0_10, %c0_11] : memref<8x256xf32, #tpu.memory_space<vmem>>, vector<8x256xf32>
    %8 = arith.truncf %7 : vector<8x256xf32> to vector<8x256xbf16>
    %c0_12 = arith.constant 0 : index
    %c0_13 = arith.constant 0 : index
    %9 = vector.load %arg2[%c0_12, %c0_13] : memref<640x128xbf16, #tpu.memory_space<vmem>>, vector<256x128xbf16>
    %cst_14 = arith.constant dense<0.000000e+00> : vector<8x128xf32>
    %10 = tpu.matmul %8, %9, %cst_14 {dimension_numbers = #tpu.dot_dimension_numbers<[1], [0], [0], [1], [0, 0, 1, 1], [], []>} : vector<8x256xbf16>, vector<256x128xbf16>, vector<8x128xf32> -> vector<8x128xf32>
    %cst_15 = arith.constant dense<0.000000e+00> : vector<128xf32>
    %11 = vector.multi_reduction <add>, %10, %cst_15 [0] : vector<8x128xf32> to vector<128xf32>
    %12 = vector.shape_cast %11 : vector<128xf32> to vector<1x128xf32>
    %cst_16 = arith.constant 1.250000e-01 : f32
    %13 = vector.broadcast %cst_16 : f32 to vector<1x128xf32>
    %14 = arith.mulf %12, %13 : vector<1x128xf32>
    %15 = vector.broadcast %14 : vector<1x128xf32> to vector<8x128xf32>
    %16 = arith.subf %10, %15 : vector<8x128xf32>
    %17 = arith.mulf %16, %16 : vector<8x128xf32>
    %cst_17 = arith.constant dense<0.000000e+00> : vector<128xf32>
    %18 = vector.multi_reduction <add>, %17, %cst_17 [0] : vector<8x128xf32> to vector<128xf32>
    %19 = vector.shape_cast %18 : vector<128xf32> to vector<1x128xf32>
    %cst_18 = arith.constant 1.250000e-01 : f32
    %20 = vector.broadcast %cst_18 : f32 to vector<1x128xf32>
    %21 = arith.mulf %19, %20 : vector<1x128xf32>
    %22 = vector.extract_strided_slice %6 {offsets = [0, 0], sizes = [1, 128], strides = [1, 1]} : vector<8x128xf32> to vector<1x128xf32>
    %cst_19 = arith.constant 9.99999974E-6 : f32
    %23 = vector.broadcast %cst_19 : f32 to vector<1x128xf32>
    %24 = arith.addf %21, %23 : vector<1x128xf32>
    %25 = math.rsqrt %24 : vector<1x128xf32>
    %26 = arith.mulf %22, %25 : vector<1x128xf32>
    %27 = vector.broadcast %26 : vector<1x128xf32> to vector<8x128xf32>
    %28 = arith.mulf %16, %27 : vector<8x128xf32>
    %29 = vector.extract_strided_slice %6 {offsets = [4, 0], sizes = [1, 128], strides = [1, 1]} : vector<8x128xf32> to vector<1x128xf32>
    %30 = vector.broadcast %29 : vector<1x128xf32> to vector<8x128xf32>
    %31 = arith.addf %28, %30 : vector<8x128xf32>
    %cst_20 = arith.constant 5.000000e-01 : f32
    %32 = vector.broadcast %cst_20 : f32 to vector<8x128xf32>
    %33 = arith.mulf %32, %31 : vector<8x128xf32>
    %34 = math.tanh %33 : vector<8x128xf32>
    %cst_21 = arith.constant 5.000000e-01 : f32
    %35 = vector.broadcast %cst_21 : f32 to vector<8x128xf32>
    %36 = arith.mulf %35, %34 : vector<8x128xf32>
    %cst_22 = arith.constant 5.000000e-01 : f32
    %37 = vector.broadcast %cst_22 : f32 to vector<8x128xf32>
    %38 = arith.addf %36, %37 : vector<8x128xf32>
    %39 = arith.truncf %38 : vector<8x128xf32> to vector<8x128xbf16>
    %c256 = arith.constant 256 : index
    %c0_23 = arith.constant 0 : index
    %40 = vector.load %arg2[%c256, %c0_23] : memref<640x128xbf16, #tpu.memory_space<vmem>>, vector<128x128xbf16>
    %cst_24 = arith.constant dense<0.000000e+00> : vector<8x128xf32>
    %41 = tpu.matmul %39, %40, %cst_24 {dimension_numbers = #tpu.dot_dimension_numbers<[1], [0], [0], [1], [0, 0, 1, 1], [], []>} : vector<8x128xbf16>, vector<128x128xbf16>, vector<8x128xf32> -> vector<8x128xf32>
    %cst_25 = arith.constant dense<0.000000e+00> : vector<128xf32>
    %42 = vector.multi_reduction <add>, %41, %cst_25 [0] : vector<8x128xf32> to vector<128xf32>
    %43 = vector.shape_cast %42 : vector<128xf32> to vector<1x128xf32>
    %cst_26 = arith.constant 1.250000e-01 : f32
    %44 = vector.broadcast %cst_26 : f32 to vector<1x128xf32>
    %45 = arith.mulf %43, %44 : vector<1x128xf32>
    %46 = vector.broadcast %45 : vector<1x128xf32> to vector<8x128xf32>
    %47 = arith.subf %41, %46 : vector<8x128xf32>
    %48 = arith.mulf %47, %47 : vector<8x128xf32>
    %cst_27 = arith.constant dense<0.000000e+00> : vector<128xf32>
    %49 = vector.multi_reduction <add>, %48, %cst_27 [0] : vector<8x128xf32> to vector<128xf32>
    %50 = vector.shape_cast %49 : vector<128xf32> to vector<1x128xf32>
    %cst_28 = arith.constant 1.250000e-01 : f32
    %51 = vector.broadcast %cst_28 : f32 to vector<1x128xf32>
    %52 = arith.mulf %50, %51 : vector<1x128xf32>
    %53 = vector.extract_strided_slice %6 {offsets = [1, 0], sizes = [1, 128], strides = [1, 1]} : vector<8x128xf32> to vector<1x128xf32>
    %cst_29 = arith.constant 9.99999974E-6 : f32
    %54 = vector.broadcast %cst_29 : f32 to vector<1x128xf32>
    %55 = arith.addf %52, %54 : vector<1x128xf32>
    %56 = math.rsqrt %55 : vector<1x128xf32>
    %57 = arith.mulf %53, %56 : vector<1x128xf32>
    %58 = vector.broadcast %57 : vector<1x128xf32> to vector<8x128xf32>
    %59 = arith.mulf %47, %58 : vector<8x128xf32>
    %60 = vector.extract_strided_slice %6 {offsets = [5, 0], sizes = [1, 128], strides = [1, 1]} : vector<8x128xf32> to vector<1x128xf32>
    %61 = vector.broadcast %60 : vector<1x128xf32> to vector<8x128xf32>
    %62 = arith.addf %59, %61 : vector<8x128xf32>
    %cst_30 = arith.constant 5.000000e-01 : f32
    %63 = vector.broadcast %cst_30 : f32 to vector<8x128xf32>
    %64 = arith.mulf %63, %62 : vector<8x128xf32>
    %65 = math.tanh %64 : vector<8x128xf32>
    %cst_31 = arith.constant 5.000000e-01 : f32
    %66 = vector.broadcast %cst_31 : f32 to vector<8x128xf32>
    %67 = arith.mulf %66, %65 : vector<8x128xf32>
    %cst_32 = arith.constant 5.000000e-01 : f32
    %68 = vector.broadcast %cst_32 : f32 to vector<8x128xf32>
    %69 = arith.addf %67, %68 : vector<8x128xf32>
    %70 = arith.truncf %69 : vector<8x128xf32> to vector<8x128xbf16>
    %c384 = arith.constant 384 : index
    %c0_33 = arith.constant 0 : index
    %71 = vector.load %arg2[%c384, %c0_33] : memref<640x128xbf16, #tpu.memory_space<vmem>>, vector<128x128xbf16>
    %cst_34 = arith.constant dense<0.000000e+00> : vector<8x128xf32>
    %72 = tpu.matmul %70, %71, %cst_34 {dimension_numbers = #tpu.dot_dimension_numbers<[1], [0], [0], [1], [0, 0, 1, 1], [], []>} : vector<8x128xbf16>, vector<128x128xbf16>, vector<8x128xf32> -> vector<8x128xf32>
    %cst_35 = arith.constant dense<0.000000e+00> : vector<128xf32>
    %73 = vector.multi_reduction <add>, %72, %cst_35 [0] : vector<8x128xf32> to vector<128xf32>
    %74 = vector.shape_cast %73 : vector<128xf32> to vector<1x128xf32>
    %cst_36 = arith.constant 1.250000e-01 : f32
    %75 = vector.broadcast %cst_36 : f32 to vector<1x128xf32>
    %76 = arith.mulf %74, %75 : vector<1x128xf32>
    %77 = vector.broadcast %76 : vector<1x128xf32> to vector<8x128xf32>
    %78 = arith.subf %72, %77 : vector<8x128xf32>
    %79 = arith.mulf %78, %78 : vector<8x128xf32>
    %cst_37 = arith.constant dense<0.000000e+00> : vector<128xf32>
    %80 = vector.multi_reduction <add>, %79, %cst_37 [0] : vector<8x128xf32> to vector<128xf32>
    %81 = vector.shape_cast %80 : vector<128xf32> to vector<1x128xf32>
    %cst_38 = arith.constant 1.250000e-01 : f32
    %82 = vector.broadcast %cst_38 : f32 to vector<1x128xf32>
    %83 = arith.mulf %81, %82 : vector<1x128xf32>
    %84 = vector.extract_strided_slice %6 {offsets = [2, 0], sizes = [1, 128], strides = [1, 1]} : vector<8x128xf32> to vector<1x128xf32>
    %cst_39 = arith.constant 9.99999974E-6 : f32
    %85 = vector.broadcast %cst_39 : f32 to vector<1x128xf32>
    %86 = arith.addf %83, %85 : vector<1x128xf32>
    %87 = math.rsqrt %86 : vector<1x128xf32>
    %88 = arith.mulf %84, %87 : vector<1x128xf32>
    %89 = vector.broadcast %88 : vector<1x128xf32> to vector<8x128xf32>
    %90 = arith.mulf %78, %89 : vector<8x128xf32>
    %91 = vector.extract_strided_slice %6 {offsets = [6, 0], sizes = [1, 128], strides = [1, 1]} : vector<8x128xf32> to vector<1x128xf32>
    %92 = vector.broadcast %91 : vector<1x128xf32> to vector<8x128xf32>
    %93 = arith.addf %90, %92 : vector<8x128xf32>
    %cst_40 = arith.constant 5.000000e-01 : f32
    %94 = vector.broadcast %cst_40 : f32 to vector<8x128xf32>
    %95 = arith.mulf %94, %93 : vector<8x128xf32>
    %96 = math.tanh %95 : vector<8x128xf32>
    %cst_41 = arith.constant 5.000000e-01 : f32
    %97 = vector.broadcast %cst_41 : f32 to vector<8x128xf32>
    %98 = arith.mulf %97, %96 : vector<8x128xf32>
    %cst_42 = arith.constant 5.000000e-01 : f32
    %99 = vector.broadcast %cst_42 : f32 to vector<8x128xf32>
    %100 = arith.addf %98, %99 : vector<8x128xf32>
    %101 = arith.truncf %100 : vector<8x128xf32> to vector<8x128xbf16>
    %c512 = arith.constant 512 : index
    %c0_43 = arith.constant 0 : index
    %102 = vector.load %arg2[%c512, %c0_43] : memref<640x128xbf16, #tpu.memory_space<vmem>>, vector<128x128xbf16>
    %cst_44 = arith.constant dense<0.000000e+00> : vector<8x128xf32>
    %103 = tpu.matmul %101, %102, %cst_44 {dimension_numbers = #tpu.dot_dimension_numbers<[1], [0], [0], [1], [0, 0, 1, 1], [], []>} : vector<8x128xbf16>, vector<128x128xbf16>, vector<8x128xf32> -> vector<8x128xf32>
    %cst_45 = arith.constant dense<0.000000e+00> : vector<128xf32>
    %104 = vector.multi_reduction <add>, %103, %cst_45 [0] : vector<8x128xf32> to vector<128xf32>
    %105 = vector.shape_cast %104 : vector<128xf32> to vector<1x128xf32>
    %cst_46 = arith.constant 1.250000e-01 : f32
    %106 = vector.broadcast %cst_46 : f32 to vector<1x128xf32>
    %107 = arith.mulf %105, %106 : vector<1x128xf32>
    %108 = vector.broadcast %107 : vector<1x128xf32> to vector<8x128xf32>
    %109 = arith.subf %103, %108 : vector<8x128xf32>
    %110 = arith.mulf %109, %109 : vector<8x128xf32>
    %cst_47 = arith.constant dense<0.000000e+00> : vector<128xf32>
    %111 = vector.multi_reduction <add>, %110, %cst_47 [0] : vector<8x128xf32> to vector<128xf32>
    %112 = vector.shape_cast %111 : vector<128xf32> to vector<1x128xf32>
    %cst_48 = arith.constant 1.250000e-01 : f32
    %113 = vector.broadcast %cst_48 : f32 to vector<1x128xf32>
    %114 = arith.mulf %112, %113 : vector<1x128xf32>
    %115 = vector.extract_strided_slice %6 {offsets = [3, 0], sizes = [1, 128], strides = [1, 1]} : vector<8x128xf32> to vector<1x128xf32>
    %cst_49 = arith.constant 9.99999974E-6 : f32
    %116 = vector.broadcast %cst_49 : f32 to vector<1x128xf32>
    %117 = arith.addf %114, %116 : vector<1x128xf32>
    %118 = math.rsqrt %117 : vector<1x128xf32>
    %119 = arith.mulf %115, %118 : vector<1x128xf32>
    %120 = vector.broadcast %119 : vector<1x128xf32> to vector<8x128xf32>
    %121 = arith.mulf %109, %120 : vector<8x128xf32>
    %122 = vector.extract_strided_slice %6 {offsets = [7, 0], sizes = [1, 128], strides = [1, 1]} : vector<8x128xf32> to vector<1x128xf32>
    %123 = vector.broadcast %122 : vector<1x128xf32> to vector<8x128xf32>
    %124 = arith.addf %121, %123 : vector<8x128xf32>
    %cst_50 = arith.constant 5.000000e-01 : f32
    %125 = vector.broadcast %cst_50 : f32 to vector<8x128xf32>
    %126 = arith.mulf %125, %124 : vector<8x128xf32>
    %127 = math.tanh %126 : vector<8x128xf32>
    %cst_51 = arith.constant 5.000000e-01 : f32
    %128 = vector.broadcast %cst_51 : f32 to vector<8x128xf32>
    %129 = arith.mulf %128, %127 : vector<8x128xf32>
    %cst_52 = arith.constant 5.000000e-01 : f32
    %130 = vector.broadcast %cst_52 : f32 to vector<8x128xf32>
    %131 = arith.addf %129, %130 : vector<8x128xf32>
    %132 = vector.extract_strided_slice %131 {offsets = [0, 0], sizes = [8, 16], strides = [1, 1]} : vector<8x128xf32> to vector<8x16xf32>
    %c0_53 = arith.constant 0 : index
    %c0_54 = arith.constant 0 : index
    %133 = vector.load %arg4[%c0_53, %c0_54] : memref<8x16xf32, #tpu.memory_space<vmem>>, vector<8x16xf32>
    tpu.vector_store %arg4[%c0_53, %c0_54], %132 {strides = array<i32>} : memref<8x16xf32, #tpu.memory_space<vmem>>, vector<8x16xf32>,
    return
  }
}

</mosaic_0001>

<bundles_post_ra>
// kernel: tpu_custom_call.1
= control target key start
LH: loop header
LB: loop body
LE: loop exit
PB: predicated region body
PF: predicated region fallthrough
CT: control target
= control target key end

     0   :  { %9 = vsyncpa [#allocation4], 0  ;;  %s1050_s0 = inlined_call_operand.hbm [shape: f32[8,10], index: 0, kind: input, shape index: {}]   ;;  %s1051_s1 = inlined_call_operand.hbm [shape: f32[8,10], index: 1, kind: input, shape index: {}]   ;;  %s1052_s2 = inlined_call_operand.hbm [shape: bf16[640,128], index: 2, kind: input, shape index: {}]   ;;  %s1053_s3 = inlined_call_operand.hbm [shape: f32[8,128], index: 3, kind: input, shape index: {}]   ;;  %s1054_s4 = inlined_call_operand.hbm [shape: f32[8,16], index: 4, kind: output, shape index: {}]  }
   0x1   :  { %10 = vsyncpa [#allocation7], 0 }
   0x2   :  { %11 = vsyncpa [#allocation10], 0  ;;  %s29_s17 = sshll.u32 %s1051_s1, 4  ;;  %s30_s17 = int_to_ptr.hbm [resolvable:$true] %s29_s17 }
   0x3   :  { %12 = vsyncpa [#allocation5], 0  ;;  %s992_s18 = smov [#allocation6]   ;;  %s18_s22 = sshll.u32 %s1050_s0, 4  ;;  %s19_s22 = int_to_ptr.hbm [resolvable:$true] %s18_s22 }
   0x4   :  { %s31_s19 = sshll.u32 %s992_s18, 4  ;;  %s993_s23 = smov [#allocation3]   ;;  %s32_s19 = int_to_ptr.vmem [resolvable:$true] %s31_s19 }
   0x5   :  { %34 = dma.hbm_to_vmem [thread:$0]  %s30_s17, 128, %s32_s19, [#allocation7]  }
   0x6   :  { %s20_s24 = sshll.u32 %s993_s23, 4  ;;  %s39_s27 = sshll.u32 %s1052_s2, 4  ;;  %s21_s24 = int_to_ptr.vmem [resolvable:$true] %s20_s24  ;;  %s40_s27 = int_to_ptr.hbm [resolvable:$true] %s39_s27 }
   0x7   :  { %23 = dma.hbm_to_vmem [thread:$0]  %s19_s22, 128, %s21_s24, [#allocation4]  }
   0x8   :  { %s994_s1 = smov [#allocation8]   ;;  %s53_s5 = sshll.u32 %s1053_s3, 4  ;;  %s54_s5 = int_to_ptr.hbm [resolvable:$true] %s53_s5 }
   0x9   :  { %s41_s28 = sshll.u32 %s994_s1, 4  ;;  %s995_s6 = smov 64   ;;  %s42_s28 = int_to_ptr.vmem [resolvable:$true] %s41_s28 }
   0xa   :  { %s996_s0 = smov 4   ;;  %s997_s7 = smov [#allocation9]  }
   0xb   :  { %47 = dma.hbm_to_vmem [thread:$0]  %s40_s27, 5120, %s42_s28, [#allocation7], %s995_s6, %s995_s6, %s996_s0  }
   0xc   :  { %s55_s8 = sshll.u32 %s997_s7, 4  ;;  %s56_s8 = int_to_ptr.vmem [resolvable:$true] %s55_s8 }
   0xd   :  { %58 = dma.hbm_to_vmem [thread:$0]  %s54_s5, 128, %s56_s8, [#allocation10]  }
   0xe   :  { %984 = dma.done.wait [#allocation4], 128  }
   0xf   :  { %985 = vsyncadd [#allocation4], 4294967168 }
  0x10   :  { %986 = dma.done.wait [#allocation7], 5248  }
  0x11   :  { %987 = vsyncadd [#allocation7], 4294962048 }
  0x12   :  { %988 = dma.done.wait [#allocation10], 128  }
  0x13   :  { %989 = vsyncadd [#allocation10], 4294967168  ;;  %v998_v0 = vmov 0.0   ;;  %v807_v1 = vld [vmem:[#allocation8 + $0x38] sm:$0xff]  ;;  %v806_v3 = vld [vmem:[#allocation8 + $0x30] sm:$0xff]  ;;  %vm78_vm0 = vcmask 80896  }
  0x14   :  { %75 = vst [vmem:[#allocation2] sm:$0xff] %v998_v0  ;;  %v815_v2 = vld [vmem:[#allocation8 + $0x78] sm:$0xff]  ;;  %215 = vmatpush.bf16.msra.mxu0 %v807_v1  ;;  %v814_v4 = vld [vmem:[#allocation8 + $0x70] sm:$0xff]  ;;  %v805_v7 = vld [vmem:[#allocation8 + $0x28] sm:$0xff]  ;;  %s999_s2 = smov [#allocation11]   ;;  %s628_s11 = sshll.u32 %s1054_s4, 4  ;;  %s629_s11 = int_to_ptr.hbm [resolvable:$true] %s628_s11 }
  0x15   :  { %76 = vst [vmem:[#allocation2 + $0x8] sm:$0xff] %v998_v0  ;;  %228 = vmatpush.bf16.msra.mxu1 %v815_v2  ;;  %v77_v5 = vld [vmem:[#allocation3] sm:$0xff]  ;;  %v80_v6 = vld [vmem:[#allocation6] sm:$0xff]  ;;  %v813_v8 = vld [vmem:[#allocation8 + $0x68] sm:$0xff]  ;;  %s626_s3 = sshll.u32 %s999_s2, 4  ;;  %vm619_vm13 = vcmask 130048   ;;  %s627_s3 = int_to_ptr.vmem [resolvable:$true] %s626_s3 }
  0x16   :  { %79 = vst.msk [vmem:[#allocation2] sm:$0xff] %vm78_vm0, %v77_v5  ;;  %v804_v9 = vld [vmem:[#allocation8 + $0x20] sm:$0xff]  ;;  %v803_v11 = vld [vmem:[#allocation8 + $0x18] sm:$0xff]  ;;  %v802_v13 = vld [vmem:[#allocation8 + $0x10] sm:$0xff] }
  0x17   :  { %81 = vst.msk [vmem:[#allocation2 + $0x8] sm:$0xff] %vm78_vm0, %v80_v6  ;;  %v812_v10 = vld [vmem:[#allocation8 + $0x60] sm:$0xff]  ;;  %v811_v12 = vld [vmem:[#allocation8 + $0x58] sm:$0xff]  ;;  %v810_v14 = vld [vmem:[#allocation8 + $0x50] sm:$0xff] }
  0x18   :  { %216 = vmatpush.bf16.msra.mxu0 %v806_v3  ;;  %v801_v15 = vld [vmem:[#allocation8 + $0x8] sm:$0xff]  ;;  %v800_v17 = vld [vmem:[#allocation8] sm:$0xff]  ;;  %v823_v34 = vld [vmem:[#allocation8 + $0xb8] sm:$0xff] }
  0x19   :  { %229 = vmatpush.bf16.msra.mxu1 %v814_v4  ;;  %v809_v16 = vld [vmem:[#allocation8 + $0x48] sm:$0xff]  ;;  %v808_v18 = vld [vmem:[#allocation8 + $0x40] sm:$0xff]  ;;  %342 = vmatpush.bf16.msra.mxu2 %v823_v34  ;;  %v822_v37 = vld [vmem:[#allocation8 + $0xb0] sm:$0xff] }
  0x1a   :  { %v821_v40 = vld [vmem:[#allocation8 + $0xa8] sm:$0xff]  ;;  %v820_v43 = vld [vmem:[#allocation8 + $0xa0] sm:$0xff]  ;;  %v819_v45 = vld [vmem:[#allocation8 + $0x98] sm:$0xff] }
  0x1b   :  { %v818_v48 = vld [vmem:[#allocation8 + $0x90] sm:$0xff]  ;;  %v817_v51 = vld [vmem:[#allocation8 + $0x88] sm:$0xff]  ;;  %v816_v52 = vld [vmem:[#allocation8 + $0x80] sm:$0xff] }
  0x1c   :  { %217 = vmatpush.bf16.msra.mxu0 %v805_v7  ;;  %v1037_v58 = vld [vmem:[#allocation9] sm:$0xff] }
  0x1d   :  { %230 = vmatpush.bf16.msra.mxu1 %v813_v8  ;;  %v83_v19 = vld [vmem:[#allocation2] sm:$0xff]  ;;  %343 = vmatpush.bf16.msra.mxu2 %v822_v37  ;;  %v271_v63 = vperm.slane %v1037_v58, 4 }
  0x1e   :  { %v84_v20 = vld [vmem:[#allocation2 + $0x8] sm:$0xff]  ;;  %v85_v21 = vpack.c.bf16 %v83_v19, %v83_v19 }
  0x1f   :  { %v86_v22 = vpack.c.bf16 %v84_v20, %v84_v20 }
  0x20   :  { %218 = vmatpush.bf16.msra.mxu0 %v804_v9 }
  0x21   :  { %231 = vmatpush.bf16.msra.mxu1 %v812_v10  ;;  %344 = vmatpush.bf16.msra.mxu2 %v821_v40 }
  0x24   :  { %219 = vmatpush.bf16.msra.mxu0 %v803_v11 }
  0x25   :  { %232 = vmatpush.bf16.msra.mxu1 %v811_v12  ;;  %345 = vmatpush.bf16.msra.mxu2 %v820_v43  ;;  %v385_v43 = vperm.slane %v1037_v58, 5 }
  0x28   :  { %220 = vmatpush.bf16.msra.mxu0 %v802_v13 }
  0x29   :  { %233 = vmatpush.bf16.msra.mxu1 %v810_v14  ;;  %346 = vmatpush.bf16.msra.mxu2 %v819_v45 }
  0x2c   :  { %221 = vmatpush.bf16.msra.mxu0 %v801_v15  ;;  %v831_v15 = vld [vmem:[#allocation8 + $0xf8] sm:$0xff] }
  0x2d   :  { %234 = vmatpush.bf16.msra.mxu1 %v809_v16  ;;  %347 = vmatpush.bf16.msra.mxu2 %v818_v48 }
  0x2e   :  { %456 = vmatpush.bf16.msra.mxu3 %v831_v15 }
  0x30   :  { %222 = vmatpush.bf16.msra.mxu0 %v800_v17 }
  0x31   :  { %235 = vmatpush.bf16.msra.mxu1 %v808_v18  ;;  %348 = vmatpush.bf16.msra.mxu2 %v817_v51  ;;  %v830_v18 = vld [vmem:[#allocation8 + $0xf0] sm:$0xff] }
  0x32   :  { %457 = vmatpush.bf16.msra.mxu3 %v830_v18 }
  0x33   :  { %223 = vmatmul.bf16.vlgmr.msra.gmra.mxu0 %v85_v21  ;;  %v829_v21 = vld [vmem:[#allocation8 + $0xe8] sm:$0xff] }
  0x34   :  { %236 = vmatmul.bf16.vlgmr.msra.gmra.mxu1 %v86_v22 }
  0x35   :  { %349 = vmatpush.bf16.msra.mxu2 %v816_v52 }
  0x36   :  { %458 = vmatpush.bf16.msra.mxu3 %v829_v21 }
  0xb0   :  { %v224_v23 = vpop.f32.mrf.mxu0 }
  0xb1   :  { %v237_v24 = vpop.f32.mrf.mxu1 }
  0xb2   :  { %v238_v25 = vadd.f32 %v237_v24, %v224_v23  ;;  %v828_v24 = vld [vmem:[#allocation8 + $0xe0] sm:$0xff] }
  0xb3   :  { %459 = vmatpush.bf16.msra.mxu3 %v828_v24  ;;  %v499_v24 = vperm.slane %v1037_v58, 6 }
  0xb4   :  { %v241_v26 = vrot.slane %v238_v25, 4 }
  0xb6   :  { %v242_v27 = vadd.f32 %v241_v26, %v238_v25  ;;  %v827_v26 = vld [vmem:[#allocation8 + $0xd8] sm:$0xff] }
  0xb7   :  { %460 = vmatpush.bf16.msra.mxu3 %v827_v26 }
  0xb8   :  { %v243_v28 = vrot.slane %v242_v27, 2  ;;  %v226_v29 = vpop.f32.mrf.mxu0 }
  0xb9   :  { %v239_v30 = vpop.f32.mrf.mxu1  ;;  %v826_v29 = vld [vmem:[#allocation8 + $0xd0] sm:$0xff] }
  0xba   :  { %v244_v31 = vadd.f32 %v243_v28, %v242_v27 }
  0xbb   :  { %461 = vmatpush.bf16.msra.mxu3 %v826_v29 }
  0xbc   :  { %v245_v32 = vrot.slane %v244_v31, 1 }
  0xbe   :  { %v246_v33 = vadd.f32 %v245_v32, %v244_v31  ;;  %v825_v32 = vld [vmem:[#allocation8 + $0xc8] sm:$0xff] }
  0xbf   :  { %462 = vmatpush.bf16.msra.mxu3 %v825_v32 }
  0xc0   :  { %v247_v35 = vmul.f32 0.125, %v246_v33  ;;  %v824_v33 = vld [vmem:[#allocation8 + $0xc0] sm:$0xff] }
  0xc2   :  { %v248_v36 = vsub.f32 %v238_v25, %v247_v35 }
  0xc3   :  { %463 = vmatpush.bf16.msra.mxu3 %v824_v33 }
  0xc4   :  { %v249_v38 = vmul.f32 %v248_v36, %v248_v36 }
  0xc6   :  { %v250_v39 = vrot.slane %v249_v38, 4 }
  0xc8   :  { %v251_v41 = vadd.f32 %v250_v39, %v249_v38 }
  0xca   :  { %v252_v42 = vrot.slane %v251_v41, 2 }
  0xcc   :  { %v253_v44 = vadd.f32 %v252_v42, %v251_v41 }
  0xce   :  { %v254_v46 = vrot.slane %v253_v44, 1 }
  0xd0   :  { %v255_v47 = vadd.f32 %v254_v46, %v253_v44 }
  0xd2   :  { %v256_v49 = vmul.f32 0.125, %v255_v47 }
  0xd4   :  { %v257_v50 = vadd.f32 1e-05, %v256_v49 }
  0xd6   :  { %848 = vrsqrt.f32 %v257_v50  ;;  %vm264_vm2 = vweird.f32 %v257_v50 }
  0xdc   :  { %v849_v53 = vpop.eup %848 }
  0xdd   :  { %v259_v54 = vmul.f32 %v849_v53, %v257_v50  ;;  %vm265_vm1 = vweird.f32 %v849_v53 }
  0xde   :  { %vm266_vm3 = vmor %vm264_vm2, %vm265_vm1 }
  0xdf   :  { %v260_v55 = vmul.f32 %v849_v53, %v259_v54 }
  0xe1   :  { %v261_v56 = vmul.f32 0.5, %v260_v55 }
  0xe3   :  { %v262_v57 = vsub.f32 1.5, %v261_v56 }
  0xe5   :  { %v263_v59 = vmul.f32 %v849_v53, %v262_v57 }
  0xe7   :  { %v267_v60 = vsel %vm266_vm3, %v849_v53, %v263_v59 }
  0xe8   :  { %v268_v61 = vmul.f32 %v267_v60, %v1037_v58  ;;  %v839_v60 = vld [vmem:[#allocation8 + $0x138] sm:$0xff] }
  0xe9   :  { %570 = vmatpush.bf16.msrb.mxu0 %v839_v60 }
  0xea   :  { %v269_v62 = vperm.slane %v268_v61, 0 }
  0xec   :  { %v270_v0 = vmul.f32 %v269_v62, %v248_v36 }
  0xee   :  { %v272_v1 = vadd.f32 %v271_v63, %v270_v0  ;;  %v838_v63 = vld [vmem:[#allocation8 + $0x130] sm:$0xff] }
  0xef   :  { %571 = vmatpush.bf16.msrb.mxu0 %v838_v63 }
  0xf0   :  { %v273_v2 = vmul.f32 0.5, %v272_v1 }
  0xf2   :  { %850 = vtanh.f32 %v273_v2  ;;  %v837_v2 = vld [vmem:[#allocation8 + $0x128] sm:$0xff] }
  0xf3   :  { %572 = vmatpush.bf16.msrb.mxu0 %v837_v2 }
  0xf8   :  { %v851_v3 = vpop.eup %850 }
  0xf9   :  { %v275_v4 = vmul.f32 0.5, %v851_v3 }
  0xfb   :  { %v276_v5 = vadd.f32 0.5, %v275_v4 }
  0xfd   :  { %v277_v6 = vpack.c.bf16 %v276_v5, %v276_v5  ;;  %v836_v5 = vld [vmem:[#allocation8 + $0x120] sm:$0xff] }
  0xfe   :  { %573 = vmatpush.bf16.msrb.mxu0 %v836_v5 }
  0xff   :  { %350 = vmatmul.bf16.vlgmr.msra.gmra.mxu2 %v277_v6 }
 0x182   :  { %v351_v7 = vpop.f32.mrf.mxu2 }
 0x183   :  { %v355_v8 = vrot.slane %v351_v7, 4 }
 0x185   :  { %v356_v9 = vadd.f32 %v355_v8, %v351_v7  ;;  %v835_v8 = vld [vmem:[#allocation8 + $0x118] sm:$0xff] }
 0x186   :  { %574 = vmatpush.bf16.msrb.mxu0 %v835_v8 }
 0x187   :  { %v357_v10 = vrot.slane %v356_v9, 2 }
 0x189   :  { %v358_v11 = vadd.f32 %v357_v10, %v356_v9  ;;  %v834_v10 = vld [vmem:[#allocation8 + $0x110] sm:$0xff] }
 0x18a   :  { %v353_v12 = vpop.f32.mrf.mxu2  ;;  %575 = vmatpush.bf16.msrb.mxu0 %v834_v10 }
 0x18b   :  { %v359_v13 = vrot.slane %v358_v11, 1 }
 0x18d   :  { %v360_v14 = vadd.f32 %v359_v13, %v358_v11  ;;  %v833_v13 = vld [vmem:[#allocation8 + $0x108] sm:$0xff] }
 0x18e   :  { %576 = vmatpush.bf16.msrb.mxu0 %v833_v13 }
 0x18f   :  { %v361_v16 = vmul.f32 0.125, %v360_v14  ;;  %v832_v14 = vld [vmem:[#allocation8 + $0x100] sm:$0xff] }
 0x191   :  { %v362_v17 = vsub.f32 %v351_v7, %v361_v16 }
 0x192   :  { %577 = vmatpush.bf16.msrb.mxu0 %v832_v14 }
 0x193   :  { %v363_v19 = vmul.f32 %v362_v17, %v362_v17 }
 0x195   :  { %v364_v20 = vrot.slane %v363_v19, 4 }
 0x197   :  { %v365_v22 = vadd.f32 %v364_v20, %v363_v19 }
 0x199   :  { %v366_v23 = vrot.slane %v365_v22, 2 }
 0x19b   :  { %v367_v25 = vadd.f32 %v366_v23, %v365_v22 }
 0x19d   :  { %v368_v27 = vrot.slane %v367_v25, 1 }
 0x19f   :  { %v369_v28 = vadd.f32 %v368_v27, %v367_v25 }
 0x1a1   :  { %v370_v30 = vmul.f32 0.125, %v369_v28 }
 0x1a3   :  { %v371_v31 = vadd.f32 1e-05, %v370_v30 }
 0x1a5   :  { %852 = vrsqrt.f32 %v371_v31  ;;  %vm378_vm5 = vweird.f32 %v371_v31 }
 0x1ab   :  { %v853_v34 = vpop.eup %852 }
 0x1ac   :  { %v373_v35 = vmul.f32 %v853_v34, %v371_v31  ;;  %vm379_vm4 = vweird.f32 %v853_v34 }
 0x1ad   :  { %vm380_vm6 = vmor %vm378_vm5, %vm379_vm4 }
 0x1ae   :  { %v374_v36 = vmul.f32 %v853_v34, %v373_v35 }
 0x1b0   :  { %v375_v37 = vmul.f32 0.5, %v374_v36 }
 0x1b2   :  { %v376_v38 = vsub.f32 1.5, %v375_v37 }
 0x1b4   :  { %v377_v39 = vmul.f32 %v853_v34, %v376_v38 }
 0x1b6   :  { %v381_v40 = vsel %vm380_vm6, %v853_v34, %v377_v39 }
 0x1b7   :  { %v382_v41 = vmul.f32 %v381_v40, %v1037_v58 }
 0x1b9   :  { %v383_v42 = vperm.slane %v382_v41, 1 }
 0x1bb   :  { %v384_v44 = vmul.f32 %v383_v42, %v362_v17 }
 0x1bd   :  { %v386_v45 = vadd.f32 %v385_v43, %v384_v44 }
 0x1bf   :  { %v387_v46 = vmul.f32 0.5, %v386_v45 }
 0x1c1   :  { %854 = vtanh.f32 %v387_v46 }
 0x1c7   :  { %v855_v47 = vpop.eup %854 }
 0x1c8   :  { %v389_v48 = vmul.f32 0.5, %v855_v47 }
 0x1ca   :  { %v390_v49 = vadd.f32 0.5, %v389_v48 }
 0x1cc   :  { %v391_v50 = vpack.c.bf16 %v390_v49, %v390_v49 }
 0x1ce   :  { %464 = vmatmul.bf16.vlgmr.msra.gmra.mxu3 %v391_v50 }
 0x251   :  { %v465_v51 = vpop.f32.mrf.mxu3 }
 0x252   :  { %v469_v52 = vrot.slane %v465_v51, 4 }
 0x254   :  { %v470_v53 = vadd.f32 %v469_v52, %v465_v51 }
 0x256   :  { %v471_v54 = vrot.slane %v470_v53, 2 }
 0x258   :  { %v472_v55 = vadd.f32 %v471_v54, %v470_v53 }
 0x259   :  { %v467_v56 = vpop.f32.mrf.mxu3 }
 0x25a   :  { %v473_v57 = vrot.slane %v472_v55, 1 }
 0x25c   :  { %v474_v59 = vadd.f32 %v473_v57, %v472_v55 }
 0x25e   :  { %v475_v61 = vmul.f32 0.125, %v474_v59 }
 0x260   :  { %v476_v62 = vsub.f32 %v465_v51, %v475_v61  ;;  %v613_v61 = vperm.slane %v1037_v58, 7 }
 0x262   :  { %v477_v0 = vmul.f32 %v476_v62, %v476_v62 }
 0x264   :  { %v478_v1 = vrot.slane %v477_v0, 4 }
 0x266   :  { %v479_v3 = vadd.f32 %v478_v1, %v477_v0 }
 0x268   :  { %v480_v4 = vrot.slane %v479_v3, 2 }
 0x26a   :  { %v481_v6 = vadd.f32 %v480_v4, %v479_v3 }
 0x26c   :  { %v482_v7 = vrot.slane %v481_v6, 1 }
 0x26e   :  { %v483_v9 = vadd.f32 %v482_v7, %v481_v6 }
 0x270   :  { %v484_v11 = vmul.f32 0.125, %v483_v9 }
 0x272   :  { %v485_v12 = vadd.f32 1e-05, %v484_v11 }
 0x274   :  { %856 = vrsqrt.f32 %v485_v12  ;;  %vm492_vm8 = vweird.f32 %v485_v12 }
 0x27a   :  { %v857_v15 = vpop.eup %856 }
 0x27b   :  { %v487_v16 = vmul.f32 %v857_v15, %v485_v12  ;;  %vm493_vm7 = vweird.f32 %v857_v15 }
 0x27c   :  { %vm494_vm9 = vmor %vm492_vm8, %vm493_vm7 }
 0x27d   :  { %v488_v17 = vmul.f32 %v857_v15, %v487_v16 }
 0x27f   :  { %v489_v18 = vmul.f32 0.5, %v488_v17 }
 0x281   :  { %v490_v19 = vsub.f32 1.5, %v489_v18 }
 0x283   :  { %v491_v20 = vmul.f32 %v857_v15, %v490_v19 }
 0x285   :  { %v495_v21 = vsel %vm494_vm9, %v857_v15, %v491_v20 }
 0x286   :  { %v496_v22 = vmul.f32 %v495_v21, %v1037_v58 }
 0x288   :  { %v497_v23 = vperm.slane %v496_v22, 2 }
 0x28a   :  { %v498_v25 = vmul.f32 %v497_v23, %v476_v62 }
 0x28c   :  { %v500_v26 = vadd.f32 %v499_v24, %v498_v25 }
 0x28e   :  { %v501_v27 = vmul.f32 0.5, %v500_v26 }
 0x290   :  { %858 = vtanh.f32 %v501_v27 }
 0x296   :  { %v859_v28 = vpop.eup %858 }
 0x297   :  { %v503_v29 = vmul.f32 0.5, %v859_v28 }
 0x299   :  { %v504_v30 = vadd.f32 0.5, %v503_v29 }
 0x29b   :  { %v505_v31 = vpack.c.bf16 %v504_v30, %v504_v30 }
 0x29d   :  { %578 = vmatmul.bf16.vlgmr.msrb.gmra.mxu0 %v505_v31 }
 0x31a   :  { %v579_v32 = vpop.f32.mrf.mxu0 }
 0x31b   :  { %v583_v33 = vrot.slane %v579_v32, 4 }
 0x31d   :  { %v584_v34 = vadd.f32 %v583_v33, %v579_v32 }
 0x31f   :  { %v585_v35 = vrot.slane %v584_v34, 2 }
 0x321   :  { %v586_v36 = vadd.f32 %v585_v35, %v584_v34 }
 0x322   :  { %v581_v37 = vpop.f32.mrf.mxu0 }
 0x323   :  { %v587_v38 = vrot.slane %v586_v36, 1 }
 0x325   :  { %v588_v39 = vadd.f32 %v587_v38, %v586_v36 }
 0x327   :  { %v589_v40 = vmul.f32 0.125, %v588_v39 }
 0x329   :  { %v590_v41 = vsub.f32 %v579_v32, %v589_v40 }
 0x32b   :  { %v591_v42 = vmul.f32 %v590_v41, %v590_v41 }
 0x32d   :  { %v592_v43 = vrot.slane %v591_v42, 4 }
 0x32f   :  { %v593_v44 = vadd.f32 %v592_v43, %v591_v42 }
 0x331   :  { %v594_v45 = vrot.slane %v593_v44, 2 }
 0x333   :  { %v595_v46 = vadd.f32 %v594_v45, %v593_v44 }
 0x335   :  { %v596_v47 = vrot.slane %v595_v46, 1 }
 0x337   :  { %v597_v48 = vadd.f32 %v596_v47, %v595_v46 }
 0x339   :  { %v598_v49 = vmul.f32 0.125, %v597_v48 }
 0x33b   :  { %v599_v50 = vadd.f32 1e-05, %v598_v49 }
 0x33d   :  { %860 = vrsqrt.f32 %v599_v50  ;;  %vm606_vm11 = vweird.f32 %v599_v50 }
 0x343   :  { %v861_v51 = vpop.eup %860 }
 0x344   :  { %v601_v52 = vmul.f32 %v861_v51, %v599_v50  ;;  %vm607_vm10 = vweird.f32 %v861_v51 }
 0x345   :  { %vm608_vm12 = vmor %vm606_vm11, %vm607_vm10 }
 0x346   :  { %v602_v53 = vmul.f32 %v861_v51, %v601_v52 }
 0x348   :  { %v603_v54 = vmul.f32 0.5, %v602_v53 }
 0x34a   :  { %v604_v55 = vsub.f32 1.5, %v603_v54 }
 0x34c   :  { %v605_v56 = vmul.f32 %v861_v51, %v604_v55 }
 0x34e   :  { %v609_v57 = vsel %vm608_vm12, %v861_v51, %v605_v56 }
 0x34f   :  { %v610_v59 = vmul.f32 %v609_v57, %v1037_v58 }
 0x351   :  { %v611_v60 = vperm.slane %v610_v59, 3 }
 0x353   :  { %v612_v62 = vmul.f32 %v611_v60, %v590_v41 }
 0x355   :  { %v614_v63 = vadd.f32 %v613_v61, %v612_v62 }
 0x357   :  { %v615_v0 = vmul.f32 0.5, %v614_v63 }
 0x359   :  { %862 = vtanh.f32 %v615_v0 }
 0x35f   :  { %v863_v1 = vpop.eup %862 }
 0x360   :  { %v617_v2 = vmul.f32 0.5, %v863_v1 }
 0x362   :  { %v618_v3 = vadd.f32 0.5, %v617_v2 }
 0x364   :  { %620 = vst.msk [vmem:[#allocation11] sm:$0xff] %vm619_vm13, %v618_v3 }
 0x365   :  { %631 = dma.vmem_to_hbm [thread:$0]  %s627_s3, 128, %s629_s11, [#allocation5]  }
 0x366   :  { %990 = dma.done.wait [#allocation5], 128  }
 0x367   :  { %991 = vsyncadd [#allocation5], 4294967168 }
 0x368   :  { %636 = vsyncpa [#allocation4], 1 }
 0x369   :  { %637 = vsyncpa [#allocation7], 1 }
 0x36a   :  { %638 = vsyncpa [#allocation10], 1 }
 0x36b   :  { %639 = vsyncpa [#allocation5], 1 }

</bundles_post_ra>
